<compile_context>
chip_gen: v5e
topology: v5e:2x2
jax: 0.10.0
libtpu: 0.0.40
codegen_flags: <defaults>
</compile_context>

<pallas_src>
import math

import jax
import jax.numpy as jnp
from jax.experimental import pallas as pl
from jax.experimental.pallas import tpu as pltpu

_LANE = 128


def _round_up(x: int, m: int) -> int:
    return ((x + m - 1) // m) * m


def _make_kernel(n_encoder_layers: int, compute_dtype):
    """Transposed (batch-in-lanes) MLP kernel.

    Per layer:  h = W @ x + b   with W (dout, din) bf16, x (din, TB) bf16, b (dout, 1) f32.
    ReLU only between encoder layers (build_mlp drops the trailing ReLU); tanh at the end.
    Ref order: state_T, (w, b) * n_layers, out_T.
    """

    def kernel(*refs):
        x_ref, out_ref = refs[0], refs[-1]
        wb = refs[1:-1]
        n_layers = len(wb) // 2          # encoder layers + 1 decoder layer

        x = x_ref[...]                   # (S, TB), already compute_dtype (bf16)
        h = None
        for li in range(n_layers):
            w = wb[2 * li][...]          # (dout, din) bf16  -> MXU operand
            b = wb[2 * li + 1][...]      # (dout, 1)   f32   -> lane-broadcast add
            h = jnp.dot(w, x, preferred_element_type=jnp.float32) + b
            if li < n_encoder_layers - 1:
                h = jnp.maximum(h, 0.0)              # f32 ReLU (v5e-safe)
            if li < n_layers - 1:
                x = h.astype(compute_dtype)          # bf16 only for the next MXU operand
        out_ref[...] = jnp.tanh(h)                   # f32 epilogue, lane-dense store

    return kernel


def init_params(key, state_dim: int, action_dim: int, net_dims):
    """Synthetic params matching the PyTorch module's shapes.

    Weights are (out_features, in_features) (PyTorch convention); biases are (out, 1).
    state_avg/state_std get non-trivial values (PyTorch inits zeros/ones) so the
    normalization-folding path is actually exercised.
    """
    dims = [state_dim, *net_dims, action_dim]
    keys = jax.random.split(key, len(dims) + 1)

    def linear(k, din, dout):
        kw, kb = jax.random.split(k)
        bound = 1.0 / math.sqrt(din)
        w = jax.random.uniform(kw, (dout, din), jnp.float32, -bound, bound)
        b = jax.random.uniform(kb, (dout, 1), jnp.float32, -bound, bound)
        return w, b

    layers = [linear(keys[i], dims[i], dims[i + 1]) for i in range(len(dims) - 1)]
    ka, ks = jax.random.split(keys[-1])
    return {
        "state_avg": 0.1 * jax.random.normal(ka, (state_dim,), jnp.float32),
        "state_std": jax.random.uniform(ks, (state_dim,), jnp.float32, 0.5, 1.5),
        "encoder": layers[:-1],
        "decoder": layers[-1],
    }


def prepare_params(params, *, compute_dtype=jnp.bfloat16, eps=1e-8):
    """One-time precompute (NOT per call):
      * fold (state - avg)/std into layer 1:  W1' = W1 * inv_std,  b1' = W1 @ shift + b1
      * cast weights to the MXU compute dtype (bf16); biases stay f32.
    Returns (flat (w, b)* operand tuple, n_encoder_layers)."""
    inv_std = 1.0 / jnp.maximum(params["state_std"], eps)   # eps clamp: avoid inf on std==0
    shift = -params["state_avg"] * inv_std

    layers = [*params["encoder"], params["decoder"]]
    w1, b1 = layers[0]
    layers[0] = (w1 * inv_std[None, :], w1 @ shift.reshape(-1, 1) + b1)

    flat = []
    for w, b in layers:
        flat.append(w.astype(compute_dtype))
        flat.append(b.astype(jnp.float32))
    return tuple(flat), len(params["encoder"])


def _choose_lane_tile(batch: int, block_b: int) -> int:
    if batch <= 2 * _LANE:
        return batch                      # single full-array block (no alignment needed)
    # 128-aligned lane tiles, aiming for >= ~4 grid steps (v7x megacore + pipelining),
    # capped to amortize the ~0.35us/step overhead without bloating VMEM.
    return max(_LANE, min(block_b, _round_up(pl.cdiv(batch, 4), _LANE)))


def actor_sac_forward(state, prepared, n_encoder_layers, *, block_b: int = 8192,
                      compute_dtype=jnp.bfloat16):
    """state: (B, S) f32.  prepared: flat (w, b)* tuple from prepare_params.
    Runs the MLP in the transposed batch-in-lanes layout; returns (B, A) f32."""
    B, S = state.shape
    A = prepared[-1].shape[0]
    dims = [S] + [w.shape[0] for w in prepared[0::2]]

    TB = _choose_lane_tile(B, block_b)
    # No jnp.pad: a partial last block is fine (columns are independent; Pallas masks
    # the writeback to the valid region and out_shape is exact).
    grid = (pl.cdiv(B, TB),)

    state_t = state.T.astype(compute_dtype)              # (S, B): one fused XLA op

    in_specs = [pl.BlockSpec((S, TB), lambda i: (0, i))]
    for p in prepared:
        # Constant index_map => fetched once and VMEM-resident across grid steps;
        # single-buffered so there is no useless second copy (matters on v7x's 64 MiB
        # VMEM if net_dims grows to 2-4K).
        in_specs.append(
            pl.BlockSpec(p.shape, lambda i: (0, 0), pipeline_mode=pl.Buffered(1)))

    flops = 2 * B * sum(dims[i] * dims[i + 1] for i in range(len(dims) - 1))
    bytes_accessed = (state_t.size * state_t.dtype.itemsize
                      + B * A * 4
                      + sum(int(p.size) * p.dtype.itemsize for p in prepared))

    out_t = pl.pallas_call(
        _make_kernel(n_encoder_layers, compute_dtype),
        out_shape=jax.ShapeDtypeStruct((A, B), jnp.float32),
        grid=grid,
        in_specs=in_specs,
        out_specs=pl.BlockSpec((A, TB), lambda i: (0, i)),
        compiler_params=pltpu.CompilerParams(
            dimension_semantics=("parallel",),   # batch tiles can split across v7x TCs
        ),
        cost_estimate=pl.CostEstimate(
            flops=flops, transcendentals=B * A, bytes_accessed=bytes_accessed),
    )(state_t, *prepared)

    return out_t.T                                        # (B, A)


def actor_sac_reference(state, params):
    """Pure-JAX f32 reference matching ActorSAC.forward exactly."""
    x = (state - params["state_avg"]) / params["state_std"]
    n_enc = len(params["encoder"])
    for i, (w, b) in enumerate(params["encoder"]):
        x = x @ w.T + b.reshape(-1)
        if i < n_enc - 1:
            x = jnp.maximum(x, 0.0)
    w, b = params["decoder"]
    return jnp.tanh(x @ w.T + b.reshape(-1))


def prepared_reference(state, prepared, n_encoder_layers, compute_dtype=jnp.bfloat16):
    """Pure-JAX replica of the kernel's folded / bf16 arithmetic (tight check)."""
    x = state.T.astype(compute_dtype)
    n_layers = len(prepared) // 2
    h = None
    for li in range(n_layers):
        w, b = prepared[2 * li], prepared[2 * li + 1]
        h = jnp.dot(w, x, preferred_element_type=jnp.float32) + b
        if li < n_encoder_layers - 1:
            h = jnp.maximum(h, 0.0)
        if li < n_layers - 1:
            x = h.astype(compute_dtype)
    return jnp.tanh(h).T


if __name__ == "__main__":
    key = jax.random.PRNGKey(0)
    state_dim, action_dim = 16, 8
    net_dims = (32, 32)

    k_s1, k_s2, k_p = jax.random.split(key, 3)
    params = init_params(k_p, state_dim, action_dim, net_dims)
    prepared, n_enc = prepare_params(params)

    fwd = jax.jit(lambda s: actor_sac_forward(s, prepared, n_enc))

    # Case 1: tiny batch -> one full (S, B) block, grid of 1.
    state_small = jax.random.normal(k_s1, (64, state_dim), jnp.float32)
    out_small = jax.block_until_ready(fwd(state_small))
    assert out_small.shape == (64, action_dim)
    assert jnp.max(jnp.abs(out_small - actor_sac_reference(state_small, params))) < 5e-2
    assert jnp.max(jnp.abs(out_small - prepared_reference(state_small, prepared, n_enc))) < 1e-3

    # Case 2: larger batch -> 128-lane tiles, 4-step "parallel" grid, resident weights.
    state_big = jax.random.normal(k_s2, (512, state_dim), jnp.float32)
    out_big = jax.block_until_ready(fwd(state_big))
    assert out_big.shape == (512, action_dim)
    assert jnp.max(jnp.abs(out_big - actor_sac_reference(state_big, params))) < 5e-2
    assert jnp.max(jnp.abs(out_big - prepared_reference(state_big, prepared, n_enc))) < 1e-3

    # TODO(synk): get_action / get_action_logprob (Gaussian sampling via decoder_a_std,
    # tanh log-prob correction) are not part of forward() and are not implemented here.
    print("KERNEL_OK")
</pallas_src>

<mosaic_0001>
module attributes {stable_mosaic.version = 11 : i64} {
  func.func @kernel(%arg0: i32, %arg1: memref<16x64xbf16, #tpu.memory_space<vmem>>, %arg2: memref<32x16xbf16, #tpu.memory_space<vmem>>, %arg3: memref<32x1xf32, #tpu.memory_space<vmem>>, %arg4: memref<32x32xbf16, #tpu.memory_space<vmem>>, %arg5: memref<32x1xf32, #tpu.memory_space<vmem>>, %arg6: memref<8x32xbf16, #tpu.memory_space<vmem>>, %arg7: memref<8x1xf32, #tpu.memory_space<vmem>>, %arg8: memref<8x64xf32, #tpu.memory_space<vmem>>) attributes {dimension_semantics = [#tpu.dimension_semantics<parallel>], iteration_bounds = array<i64: 1>, scalar_prefetch = 0 : i64, scratch_operands = 0 : i64, tpu.core_type = #tpu.core_type<tc>, window_params = [{transform_indices = @transform_0, window_bounds = array<i64: 16, 64>}, {pipeline_mode = #tpu.pipeline_mode<synchronous>, transform_indices = @transform_1, window_bounds = array<i64: 32, 16>}, {pipeline_mode = #tpu.pipeline_mode<synchronous>, transform_indices = @transform_2, window_bounds = array<i64: 32, 1>}, {pipeline_mode = #tpu.pipeline_mode<synchronous>, transform_indices = @transform_3, window_bounds = array<i64: 32, 32>}, {pipeline_mode = #tpu.pipeline_mode<synchronous>, transform_indices = @transform_4, window_bounds = array<i64: 32, 1>}, {pipeline_mode = #tpu.pipeline_mode<synchronous>, transform_indices = @transform_5, window_bounds = array<i64: 8, 32>}, {pipeline_mode = #tpu.pipeline_mode<synchronous>, transform_indices = @transform_6, window_bounds = array<i64: 8, 1>}, {transform_indices = @transform_7, window_bounds = array<i64: 8, 64>}]} {
    %c0 = arith.constant 0 : index
    %c0_0 = arith.constant 0 : index
    %0 = vector.load %arg1[%c0, %c0_0] : memref<16x64xbf16, #tpu.memory_space<vmem>>, vector<16x64xbf16>
    %c0_1 = arith.constant 0 : index
    %c0_2 = arith.constant 0 : index
    %1 = vector.load %arg2[%c0_1, %c0_2] : memref<32x16xbf16, #tpu.memory_space<vmem>>, vector<32x16xbf16>
    %c0_3 = arith.constant 0 : index
    %c0_4 = arith.constant 0 : index
    %2 = vector.load %arg3[%c0_3, %c0_4] : memref<32x1xf32, #tpu.memory_space<vmem>>, vector<32x1xf32>
    %cst = arith.constant dense<0.000000e+00> : vector<32x64xf32>
    %3 = tpu.matmul %1, %0, %cst {dimension_numbers = #tpu.dot_dimension_numbers<[1], [0], [0], [1], [0, 0, 1, 1], [], []>} : vector<32x16xbf16>, vector<16x64xbf16>, vector<32x64xf32> -> vector<32x64xf32>
    %4 = vector.broadcast %2 : vector<32x1xf32> to vector<32x64xf32>
    %5 = arith.addf %3, %4 : vector<32x64xf32>
    %cst_5 = arith.constant 0.000000e+00 : f32
    %6 = vector.broadcast %cst_5 : f32 to vector<32x64xf32>
    %7 = arith.maximumf %5, %6 : vector<32x64xf32>
    %8 = arith.truncf %7 : vector<32x64xf32> to vector<32x64xbf16>
    %c0_6 = arith.constant 0 : index
    %c0_7 = arith.constant 0 : index
    %9 = vector.load %arg4[%c0_6, %c0_7] : memref<32x32xbf16, #tpu.memory_space<vmem>>, vector<32x32xbf16>
    %c0_8 = arith.constant 0 : index
    %c0_9 = arith.constant 0 : index
    %10 = vector.load %arg5[%c0_8, %c0_9] : memref<32x1xf32, #tpu.memory_space<vmem>>, vector<32x1xf32>
    %cst_10 = arith.constant dense<0.000000e+00> : vector<32x64xf32>
    %11 = tpu.matmul %9, %8, %cst_10 {dimension_numbers = #tpu.dot_dimension_numbers<[1], [0], [0], [1], [0, 0, 1, 1], [], []>} : vector<32x32xbf16>, vector<32x64xbf16>, vector<32x64xf32> -> vector<32x64xf32>
    %12 = vector.broadcast %10 : vector<32x1xf32> to vector<32x64xf32>
    %13 = arith.addf %11, %12 : vector<32x64xf32>
    %14 = arith.truncf %13 : vector<32x64xf32> to vector<32x64xbf16>
    %c0_11 = arith.constant 0 : index
    %c0_12 = arith.constant 0 : index
    %15 = vector.load %arg6[%c0_11, %c0_12] : memref<8x32xbf16, #tpu.memory_space<vmem>>, vector<8x32xbf16>
    %c0_13 = arith.constant 0 : index
    %c0_14 = arith.constant 0 : index
    %16 = vector.load %arg7[%c0_13, %c0_14] : memref<8x1xf32, #tpu.memory_space<vmem>>, vector<8x1xf32>
    %cst_15 = arith.constant dense<0.000000e+00> : vector<8x64xf32>
    %17 = tpu.matmul %15, %14, %cst_15 {dimension_numbers = #tpu.dot_dimension_numbers<[1], [0], [0], [1], [0, 0, 1, 1], [], []>} : vector<8x32xbf16>, vector<32x64xbf16>, vector<8x64xf32> -> vector<8x64xf32>
    %18 = vector.broadcast %16 : vector<8x1xf32> to vector<8x64xf32>
    %19 = arith.addf %17, %18 : vector<8x64xf32>
    %20 = math.tanh %19 : vector<8x64xf32>
    %c0_16 = arith.constant 0 : index
    %c0_17 = arith.constant 0 : index
    %21 = vector.load %arg8[%c0_16, %c0_17] : memref<8x64xf32, #tpu.memory_space<vmem>>, vector<8x64xf32>
    tpu.vector_store %arg8[%c0_16, %c0_17], %20 {strides = array<i32>} : memref<8x64xf32, #tpu.memory_space<vmem>>, vector<8x64xf32>,
    return
  }
  func.func @transform_0(%arg0: i32) -> (i32, i32) {
    %c0_i32 = arith.constant 0 : i32
    %c0_i32_0 = arith.constant 0 : i32
    return %c0_i32, %arg0 : i32, i32
  }
  func.func @transform_1(%arg0: i32) -> (i32, i32) {
    %c0_i32 = arith.constant 0 : i32
    %c0_i32_0 = arith.constant 0 : i32
    %c0_i32_1 = arith.constant 0 : i32
    return %c0_i32, %c0_i32_0 : i32, i32
  }
  func.func @transform_2(%arg0: i32) -> (i32, i32) {
    %c0_i32 = arith.constant 0 : i32
    %c0_i32_0 = arith.constant 0 : i32
    %c0_i32_1 = arith.constant 0 : i32
    return %c0_i32, %c0_i32_0 : i32, i32
  }
  func.func @transform_3(%arg0: i32) -> (i32, i32) {
    %c0_i32 = arith.constant 0 : i32
    %c0_i32_0 = arith.constant 0 : i32
    %c0_i32_1 = arith.constant 0 : i32
    return %c0_i32, %c0_i32_0 : i32, i32
  }
  func.func @transform_4(%arg0: i32) -> (i32, i32) {
    %c0_i32 = arith.constant 0 : i32
    %c0_i32_0 = arith.constant 0 : i32
    %c0_i32_1 = arith.constant 0 : i32
    return %c0_i32, %c0_i32_0 : i32, i32
  }
  func.func @transform_5(%arg0: i32) -> (i32, i32) {
    %c0_i32 = arith.constant 0 : i32
    %c0_i32_0 = arith.constant 0 : i32
    %c0_i32_1 = arith.constant 0 : i32
    return %c0_i32, %c0_i32_0 : i32, i32
  }
  func.func @transform_6(%arg0: i32) -> (i32, i32) {
    %c0_i32 = arith.constant 0 : i32
    %c0_i32_0 = arith.constant 0 : i32
    %c0_i32_1 = arith.constant 0 : i32
    return %c0_i32, %c0_i32_0 : i32, i32
  }
  func.func @transform_7(%arg0: i32) -> (i32, i32) {
    %c0_i32 = arith.constant 0 : i32
    %c0_i32_0 = arith.constant 0 : i32
    return %c0_i32, %arg0 : i32, i32
  }
}

</mosaic_0001>

<bundles_post_ra>
// kernel: _lambda_.1
= control target key start
LH: loop header
LB: loop body
LE: loop exit
PB: predicated region body
PF: predicated region fallthrough
CT: control target
= control target key end

     0   :  { %12 = vsyncpa [#allocation3], 0  ;;  %s490_s0 = inlined_call_operand.vmem [shape: bf16[16,64], index: 0, kind: input, shape index: {}]   ;;  %s491_s1 = inlined_call_operand.hbm [shape: bf16[32,16], index: 1, kind: input, shape index: {}]   ;;  %s492_s2 = inlined_call_operand.hbm [shape: f32[32,1], index: 2, kind: input, shape index: {}]   ;;  %s493_s3 = inlined_call_operand.vmem [shape: bf16[32,32], index: 3, kind: input, shape index: {}]   ;;  %s494_s4 = inlined_call_operand.hbm [shape: f32[32,1], index: 4, kind: input, shape index: {}]   ;;  %s495_s5 = inlined_call_operand.vmem [shape: bf16[8,32], index: 5, kind: input, shape index: {}]   ;;  %s496_s6 = inlined_call_operand.vmem [shape: f32[8,1], index: 6, kind: input, shape index: {}]   ;;  %s497_s7 = inlined_call_operand.hbm [shape: f32[8,64], index: 7, kind: output, shape index: {}]  }
   0x1   :  { %13 = vsyncpa [#allocation6], 0  ;;  %s34_s26 = sshll.u32 %s492_s2, 4  ;;  %s35_s26 = int_to_ptr.hbm [resolvable:$true] %s34_s26 }
   0x2   :  { %14 = vsyncpa [#allocation4], 0  ;;  %s411_s27 = smov [#allocation5]   ;;  %s21_s8 = sshll.u32 %s491_s1, 4  ;;  %s22_s8 = int_to_ptr.hbm [resolvable:$true] %s21_s8 }
   0x3   :  { %s36_s28 = sshll.u32 %s411_s27, 4  ;;  %s412_s9 = smov 128   ;;  %s37_s28 = int_to_ptr.vmem [resolvable:$true] %s36_s28 }
   0x4   :  { %s413_s10 = smov 8   ;;  %s414_s11 = smov [#allocation2]  }
   0x5   :  { %42 = dma.hbm_to_vmem [thread:$0]  %s35_s26, 512, %s37_s28, [#allocation6], %s412_s9, %s412_s9, %s413_s10  }
   0x6   :  { %s23_s12 = sshll.u32 %s414_s11, 4  ;;  %s415_s13 = smov 64   ;;  %s24_s12 = int_to_ptr.vmem [resolvable:$true] %s23_s12 }
   0x7   :  { %s416_s14 = smov 4   ;;  %s49_s16 = sshll.u32 %s494_s4, 4  ;;  %s50_s16 = int_to_ptr.hbm [resolvable:$true] %s49_s16 }
   0x8   :  { %29 = dma.hbm_to_vmem [thread:$0]  %s22_s8, 256, %s24_s12, [#allocation3], %s415_s13, %s415_s13, %s416_s14  }
   0x9   :  { %s417_s17 = smov [#allocation7]  }
   0xa   :  { %s51_s18 = sshll.u32 %s417_s17, 4  ;;  %s52_s18 = int_to_ptr.vmem [resolvable:$true] %s51_s18 }
   0xb   :  { %57 = dma.hbm_to_vmem [thread:$0]  %s50_s16, 512, %s52_s18, [#allocation6], %s412_s9, %s412_s9, %s413_s10  }
   0xc   :  { %405 = dma.done.wait [#allocation3], 256  }
   0xd   :  { %406 = vsyncadd [#allocation3], 4294967040 }
   0xe   :  { %407 = dma.done.wait [#allocation6], 1024  }
   0xf   :  { %408 = vsyncadd [#allocation6], 4294966272  ;;  %v418_v0 = vmov 0   ;;  %v288_v1 = vld [vmem:[%s490_s0] sm:$0xff]  ;;  %v81_v4 = vld [vmem:[#allocation5] sm:$0xff]  ;;  %vm121_vm0 = vcmask 130048  }
  0x10   :  { %305 = vset.pattern.permute.xlu1 %v418_v0  ;;  %304 = vset.pattern.permute.xlu0 %v418_v0  ;;  %v83_v2 = vld [vmem:[#allocation5 + $0x10] sm:$0xff]  ;;  %v84_v5 = vld [vmem:[#allocation5 + $0x18] sm:$0xff]  ;;  %v82_v6 = vld [vmem:[#allocation5 + $0x8] sm:$0xff]  ;;  %vm191_vm1 = vcmask 261120   ;;  %s419_s24 = smov [#allocation8]   ;;  %s252_s28 = sshll.u32 %s497_s7, 4  ;;  %s253_s28 = int_to_ptr.hbm [resolvable:$true] %s252_s28 }
  0x11   :  { %306 = vset.pattern.permute.xlu2 %v418_v0  ;;  %v289_v3 = vld [vmem:[#allocation2] sm:$0xff]  ;;  %97 = vperm.xlu0 %304, %v83_v2   ;;  %v157_v7 = vld [vmem:[#allocation7] sm:$0xff]  ;;  %v158_v8 = vld [vmem:[#allocation7 + $0x8] sm:$0xff]  ;;  %s250_s25 = sshll.u32 %s419_s24, 4  ;;  %vm243_vm2 = vcmask 523264   ;;  %s251_s25 = int_to_ptr.vmem [resolvable:$true] %s250_s25 }
  0x12   :  { %135 = vmatpush.bf16.msra.mxu0 %v288_v1  ;;  %87 = vperm.xlu1 %305, %v81_v4   ;;  %v290_v9 = vld [vmem:[#allocation2 + $0x8] sm:$0xff]  ;;  %v159_v11 = vld [vmem:[#allocation7 + $0x10] sm:$0xff] }
  0x13   :  { %173 = vperm.xlu2 %306, %v159_v11   ;;  %v160_v14 = vld [vmem:[#allocation7 + $0x18] sm:$0xff]  ;;  %v220_v17 = vld [vmem:[%s496_s6] sm:$0xff] }
  0x14   :  { %v291_v31 = vld [vmem:[%s493_s3] sm:$0xff]  ;;  %v292_v32 = vld [vmem:[%s493_s3 + $0x8] sm:$0xff] }
  0x15   :  { %275 = vmatmul.msk.bf16.vlgmr.msra.gmra.mxu0 %vm121_vm0, %v289_v3  ;;  %v219_v47 = vld [vmem:[%s495_s5] sm:$0xf] }
  0x19   :  { %102 = vperm.xlu0 %304, %v84_v5  }
  0x1a   :  { %92 = vperm.xlu1 %305, %v82_v6  }
  0x1b   :  { %178 = vperm.xlu2 %306, %v160_v14  }
  0x21   :  { %163 = vperm.xlu0 %304, %v157_v7  }
  0x22   :  { %168 = vperm.xlu1 %305, %v158_v8  }
  0x23   :  { %223 = vperm.xlu2 %306, %v220_v17  }
  0x25   :  { %276 = vmatmul.msk.bf16.gmra.mxu0 %vm121_vm0, %v290_v9 }
  0x6d   :  { %v174_v33 = vpop.permute.xlu2 %173 }
  0x75   :  { %v179_v36 = vpop.permute.xlu2 %178 }
  0x7d   :  { %v224_v48 = vpop.permute.xlu2 %223 }
  0x83   :  { %v98_v15 = vpop.permute.xlu0 %97 }
  0x84   :  { %v88_v13 = vpop.permute.xlu1 %87 }
  0x8b   :  { %v103_v20 = vpop.permute.xlu0 %102 }
  0x8c   :  { %v93_v18 = vpop.permute.xlu1 %92 }
  0x92   :  { %v137_v10 = vpop.f32.mrf.mxu0 }
  0x93   :  { %v138_v24 = vadd.f32 %v137_v10, %v88_v13  ;;  %v164_v44 = vpop.permute.xlu0 %163 }
  0x94   :  { %v169_v41 = vpop.permute.xlu1 %168 }
  0x95   :  { %v147_v29 = vmax.f32 %v138_v24, 0.0 }
  0x9a   :  { %v139_v12 = vpop.f32.mrf.mxu0 }
  0x9b   :  { %v140_v22 = vadd.f32 %v139_v12, %v93_v18 }
  0x9d   :  { %v148_v27 = vmax.f32 %v140_v22, 0.0 }
  0x9f   :  { %v151_v30 = vpack.c.bf16 %v148_v27, %v147_v29 }
  0xa2   :  { %v142_v16 = vpop.f32.mrf.mxu0 }
  0xa3   :  { %v143_v19 = vadd.f32 %v142_v16, %v98_v15 }
  0xa5   :  { %v149_v25 = vmax.f32 %v143_v19, 0.0 }
  0xaa   :  { %v144_v21 = vpop.f32.mrf.mxu0 }
  0xab   :  { %v145_v23 = vadd.f32 %v144_v21, %v103_v20 }
  0xad   :  { %v150_v26 = vmax.f32 %v145_v23, 0.0 }
  0xaf   :  { %v152_v28 = vpack.c.bf16 %v150_v26, %v149_v25 }
  0xb1   :  { %204 = vmatpush.bf16.msra.mxu1 %v152_v28  ;;  %293 = vmatpush.bf16.msra.mxu3 %v152_v28 }
  0xb5   :  { %205 = vmatpush.bf16.msra.mxu1 %v151_v30  ;;  %294 = vmatpush.bf16.msra.mxu3 %v151_v30 }
  0xb8   :  { %285 = vmatmul.msk.bf16.vlgmr.msra.gmra.mxu1 %vm191_vm1, %v291_v31  ;;  %286 = vmatmul.msk.bf16.vlgmr.msra.gmra.mxu3 %vm191_vm1, %v292_v32 }
 0x135   :  { %v207_v34 = vpop.f32.mrf.mxu1 }
 0x136   :  { %v208_v45 = vadd.f32 %v207_v34, %v164_v44 }
 0x13b   :  { %v212_v35 = vpop.f32.mrf.mxu3 }
 0x13c   :  { %v213_v39 = vadd.f32 %v212_v35, %v174_v33 }
 0x13d   :  { %v209_v37 = vpop.f32.mrf.mxu1 }
 0x13e   :  { %v210_v42 = vadd.f32 %v209_v37, %v169_v41 }
 0x140   :  { %v217_v46 = vpack.c.bf16 %v210_v42, %v208_v45 }
 0x143   :  { %v214_v38 = vpop.f32.mrf.mxu3 }
 0x144   :  { %v215_v40 = vadd.f32 %v214_v38, %v179_v36 }
 0x146   :  { %v218_v43 = vpack.c.bf16 %v215_v40, %v213_v39 }
 0x148   :  { %235 = vmatpush.bf16.msra.mxu2 %v218_v43 }
 0x14c   :  { %236 = vmatpush.bf16.msra.mxu2 %v217_v46 }
 0x14f   :  { %287 = vmatmul.msk.bf16.vlgmr.msra.gmra.mxu2 %vm191_vm1, %v219_v47 }
 0x1d2   :  { %v238_v49 = vpop.f32.mrf.mxu2 }
 0x1d3   :  { %v239_v50 = vadd.f32 %v238_v49, %v224_v48 }
 0x1d5   :  { %307 = vtanh.f32 %v239_v50 }
 0x1da   :  { %v240_v51 = vpop.f32.mrf.mxu2 }
 0x1db   :  { %v308_v52 = vpop.eup %307 }
 0x1dc   :  { %244 = vst.msk [vmem:[#allocation8] sm:$0xff] %vm243_vm2, %v308_v52 }
 0x1dd   :  { %255 = dma.vmem_to_hbm [thread:$0]  %s251_s25, 128, %s253_s28, [#allocation4]  }
 0x1de   :  { %409 = dma.done.wait [#allocation4], 128  }
 0x1df   :  { %410 = vsyncadd [#allocation4], 4294967168 }
 0x1e0   :  { %260 = vsyncpa [#allocation3], 1 }
 0x1e1   :  { %261 = vsyncpa [#allocation6], 1 }
 0x1e2   :  { %262 = vsyncpa [#allocation4], 1 }

</bundles_post_ra>
